<compile_context>
chip_gen: v5e
topology: v5e:2x2
jax: 0.10.0
libtpu: 0.0.40
codegen_flags: <defaults>
</compile_context>

<pallas_src>
import jax
import jax.numpy as jnp
import numpy as np
from jax.experimental import pallas as pl
from jax.experimental.pallas import tpu as pltpu

LANE = 128        # lane-dense padded feature width
SUB = 8           # sublane multiple
EDGE_TILE = 512   # default edge-reduction tile when the graph has many edges


def _round_up(n, m):
    return ((n + m - 1) // m) * m


def gine_stack_kernel(x0_ref, src_ref, dst_ref, ea_ref,
                      we_ref, be_ref, eps_ref, w1_ref, b1_ref, w2_ref, b2_ref,
                      out_ref, x_cur, aggr):
    l = pl.program_id(0)
    e = pl.program_id(1)
    n_l = pl.num_programs(0)
    n_e = pl.num_programs(1)
    TE = src_ref.shape[0]          # edges in this tile
    N = x_cur.shape[0]             # padded node count

    # Very first grid step: bring the (padded) input features into the
    # VMEM-resident node-feature buffer.
    @pl.when((l == 0) & (e == 0))
    def _():
        x_cur[...] = x0_ref[...]

    # First edge tile of every layer: fuse the (1 + eps) * x skip into the
    # accumulator init.
    @pl.when(e == 0)
    def _():
        aggr[...] = (1.0 + eps_ref[...]) * x_cur[...]

    x = x_cur[...]                                              # (N, P)

    # GINEConv edge embedding: Linear(edge_dim=1 -> P) == broadcast mul + bias.
    emb = ea_ref[...] * we_ref[...] + be_ref[...]               # (TE, P)

    # Gather x[src] for this edge tile: one-hot selector built in-register
    # from the int32 indices (VPU iota compare), then pushed through the MXU.
    src = src_ref[...]                                          # (TE, 1) int32
    gsel = (jax.lax.broadcasted_iota(jnp.int32, (TE, N), 1) == src
            ).astype(jnp.float32)                               # (TE, N)
    x_src = jnp.dot(gsel, x, preferred_element_type=jnp.float32)  # (TE, P)

    # message = relu(x[src] + edge_emb)
    msg = jnp.maximum(x_src + emb, 0.0)

    # Scatter-add onto destination nodes (padded edges carry dst == N_pad, so
    # their indicator column is all-zero and they contribute nothing).
    dst = dst_ref[...]                                          # (1, TE) int32
    ssel = (jax.lax.broadcasted_iota(jnp.int32, (N, TE), 0) == dst
            ).astype(jnp.float32)                               # (N, TE)
    aggr[...] += jnp.dot(ssel, msg, preferred_element_type=jnp.float32)

    # Last edge tile of the layer: 2-layer MLP + trailing relu, update the
    # resident node features (dropout == identity in eval mode).
    @pl.when(e == n_e - 1)
    def _():
        h = aggr[...]
        h1 = jnp.dot(h, w1_ref[...], preferred_element_type=jnp.float32) + b1_ref[...]
        h1 = jnp.maximum(h1, 0.0)
        h2 = jnp.dot(h1, w2_ref[...], preferred_element_type=jnp.float32) + b2_ref[...]
        x_cur[...] = jnp.maximum(h2, 0.0)

    # Only the final layer's activations leave the chip.
    @pl.when((e == n_e - 1) & (l == n_l - 1))
    def _():
        out_ref[...] = x_cur[...]


def gnn_forward(x, edge_index, edge_attr, layer_params, *, edge_tile=EDGE_TILE):
    """GNNModel.forward: stacked GINEConv -> relu -> dropout(identity), one kernel."""
    N, f_in = x.shape
    E = edge_index.shape[1]
    L = len(layer_params)
    H = layer_params[-1]["w2"].shape[1]

    # Padded sizes: features lane-dense, nodes sublane-aligned, edge tiles
    # lane-aligned when tiled (so dst row-vector blocks are full lanes).
    P = _round_up(max(f_in, H), LANE)
    N_pad = _round_up(N, SUB)
    edge_tile = _round_up(edge_tile, LANE)
    if E <= edge_tile:
        E_pad = _round_up(E, SUB)
        te = E_pad
    else:
        E_pad = _round_up(E, edge_tile)
        te = edge_tile
    n_et = E_pad // te

    # Zero-pad node features.
    xp = jnp.zeros((N_pad, P), jnp.float32).at[:N, :f_in].set(x)

    # Edge indices as small int32 vectors (no dense one-hot in HBM).
    src = edge_index[0].astype(jnp.int32)
    dst = edge_index[1].astype(jnp.int32)
    src_col = jnp.zeros((E_pad, 1), jnp.int32).at[:E, 0].set(src)
    # Padded edges point at a non-existent node row -> scatter indicator is zero.
    dst_row = jnp.full((1, E_pad), N_pad, jnp.int32).at[0, :E].set(dst)
    ea = jnp.zeros((E_pad, 1), jnp.float32).at[:E, :].set(edge_attr)

    # Stack + zero-pad per-layer parameters to a common (L, ...) shape.
    def pad_mat(w):
        return jnp.zeros((P, P), jnp.float32).at[:w.shape[0], :w.shape[1]].set(w)

    def pad_row(b):
        return jnp.zeros((1, P), jnp.float32).at[:, :b.shape[1]].set(b)

    we = jnp.stack([pad_row(p["we"]) for p in layer_params])     # (L, 1, P)
    be = jnp.stack([pad_row(p["be"]) for p in layer_params])     # (L, 1, P)
    eps = jnp.stack([p["eps"] for p in layer_params])            # (L, 1, 1)
    w1 = jnp.stack([pad_mat(p["w1"]) for p in layer_params])     # (L, P, P)
    b1 = jnp.stack([pad_row(p["b1"]) for p in layer_params])     # (L, 1, P)
    w2 = jnp.stack([pad_mat(p["w2"]) for p in layer_params])     # (L, P, P)
    b2 = jnp.stack([pad_row(p["b2"]) for p in layer_params])     # (L, 1, P)

    layer_mat = pl.BlockSpec((None, P, P), lambda l, e: (l, 0, 0))
    layer_row = pl.BlockSpec((None, 1, P), lambda l, e: (l, 0, 0))

    out = pl.pallas_call(
        gine_stack_kernel,
        out_shape=jax.ShapeDtypeStruct((N_pad, P), jnp.float32),
        grid_spec=pltpu.PrefetchScalarGridSpec(
            num_scalar_prefetch=0,
            grid=(L, n_et),
            in_specs=[
                pl.BlockSpec((N_pad, P), lambda l, e: (0, 0)),        # x0 (input feats)
                pl.BlockSpec((te, 1), lambda l, e: (e, 0)),           # src indices
                pl.BlockSpec((1, te), lambda l, e: (0, e)),           # dst indices
                pl.BlockSpec((te, 1), lambda l, e: (e, 0)),           # edge_attr
                layer_row,                                            # we
                layer_row,                                            # be
                pl.BlockSpec((None, 1, 1), lambda l, e: (l, 0, 0)),   # eps
                layer_mat,                                            # w1
                layer_row,                                            # b1
                layer_mat,                                            # w2
                layer_row,                                            # b2
            ],
            out_specs=pl.BlockSpec((N_pad, P), lambda l, e: (0, 0)),
            scratch_shapes=[pltpu.VMEM((N_pad, P), jnp.float32),      # x_cur (resident x)
                            pltpu.VMEM((N_pad, P), jnp.float32)],     # aggr accumulator
        ),
        compiler_params=pltpu.CompilerParams(
            # layer axis and edge-reduction axis are both sequential dependencies
            dimension_semantics=("arbitrary", "arbitrary"),
            vmem_limit_bytes=64 * 1024 * 1024,
        ),
    )(xp, src_col, dst_row, ea, we, be, eps, w1, b1, w2, b2)

    return out[:N, :H]


def init_params(key, input_dim, hidden_dim, num_layers):
    params = []
    din = input_dim
    for layer in range(num_layers):
        keys = jax.random.split(jax.random.fold_in(key, layer), 6)
        s1 = 1.0 / np.sqrt(din)
        s2 = 1.0 / np.sqrt(hidden_dim)
        params.append({
            # GINEConv edge projection: Linear(edge_dim=1, din)
            "we": jax.random.uniform(keys[0], (1, din), jnp.float32, -1.0, 1.0),
            "be": jax.random.uniform(keys[1], (1, din), jnp.float32, -1.0, 1.0),
            # train_eps=True, initialized to 0.0 (PyG default)
            "eps": jnp.zeros((1, 1), jnp.float32),
            # nn.Sequential(Linear(din, H), ReLU, Linear(H, H)) -- stored (in, out)
            "w1": jax.random.uniform(keys[2], (din, hidden_dim), jnp.float32, -s1, s1),
            "b1": jax.random.uniform(keys[3], (1, hidden_dim), jnp.float32, -s1, s1),
            "w2": jax.random.uniform(keys[4], (hidden_dim, hidden_dim), jnp.float32, -s2, s2),
            "b2": jax.random.uniform(keys[5], (1, hidden_dim), jnp.float32, -s2, s2),
        })
        din = hidden_dim
    return params


def reference_forward(x, edge_index, edge_attr, layer_params):
    """Pure-JAX reference (segment_sum scatter-add) for correctness check."""
    N = x.shape[0]
    src, dst = edge_index[0], edge_index[1]
    for p in layer_params:
        e = edge_attr * p["we"] + p["be"]
        msg = jax.nn.relu(x[src] + e)
        aggr = jax.ops.segment_sum(msg, dst, num_segments=N)
        h = (1.0 + p["eps"][0, 0]) * x + aggr
        h1 = jax.nn.relu(h @ p["w1"] + p["b1"])
        x = jax.nn.relu(h1 @ p["w2"] + p["b2"])
    return x


def _run_case(key, N, E, input_dim, hidden_dim, num_layers, edge_tile):
    kx, ke, ksrc, kdst, kp = jax.random.split(key, 5)
    x = jax.random.normal(kx, (N, input_dim), jnp.float32)
    src = jax.random.randint(ksrc, (E,), 0, N, jnp.int32)
    dst = jax.random.randint(kdst, (E,), 0, N, jnp.int32)
    edge_index = jnp.stack([src, dst])                  # (2, E), PyG convention
    edge_attr = jax.random.normal(ke, (E, 1), jnp.float32)
    params = init_params(kp, input_dim, hidden_dim, num_layers)

    out = gnn_forward(x, edge_index, edge_attr, params, edge_tile=edge_tile)
    out = jax.block_until_ready(out)

    ref = reference_forward(x, edge_index, edge_attr, params)
    err = float(np.max(np.abs(np.asarray(out) - np.asarray(ref))))
    assert np.allclose(np.asarray(out), np.asarray(ref), atol=1e-4, rtol=1e-4), err


if __name__ == "__main__":
    key = jax.random.PRNGKey(0)

    # Case 1: small graph, single edge tile (matches the module's typical use).
    _run_case(jax.random.fold_in(key, 1),
              N=16, E=32, input_dim=8, hidden_dim=32, num_layers=2, edge_tile=512)

    # Case 2: more edges than one tile -> exercises the tiled edge reduction
    # (accumulator across edge tiles) and per-layer weight streaming.
    _run_case(jax.random.fold_in(key, 2),
              N=32, E=300, input_dim=12, hidden_dim=64, num_layers=3, edge_tile=128)

    # TODO(synk): F.dropout with training=True (random mask) not implemented;
    # forward here corresponds to eval mode (dropout == identity).
    print("KERNEL_OK")
</pallas_src>

<mosaic_0001>
module attributes {stable_mosaic.version = 11 : i64} {
  func.func @gine_stack_kernel(%arg0: i32, %arg1: i32, %arg2: memref<16x128xf32, #tpu.memory_space<vmem>>, %arg3: memref<32x1xi32, #tpu.memory_space<vmem>>, %arg4: memref<1x32xi32, #tpu.memory_space<vmem>>, %arg5: memref<32x1xf32, #tpu.memory_space<vmem>>, %arg6: memref<1x1x128xf32, #tpu.memory_space<vmem>>, %arg7: memref<1x1x128xf32, #tpu.memory_space<vmem>>, %arg8: memref<1x1x1xf32, #tpu.memory_space<vmem>>, %arg9: memref<1x128x128xf32, #tpu.memory_space<vmem>>, %arg10: memref<1x1x128xf32, #tpu.memory_space<vmem>>, %arg11: memref<1x128x128xf32, #tpu.memory_space<vmem>>, %arg12: memref<1x1x128xf32, #tpu.memory_space<vmem>>, %arg13: memref<16x128xf32, #tpu.memory_space<vmem>>, %arg14: memref<16x128xf32, #tpu.memory_space<vmem>>, %arg15: memref<16x128xf32, #tpu.memory_space<vmem>>) attributes {dimension_semantics = [#tpu.dimension_semantics<arbitrary>, #tpu.dimension_semantics<arbitrary>], iteration_bounds = array<i64: 2, 1>, scalar_prefetch = 0 : i64, scratch_operands = 2 : i64, tpu.core_type = #tpu.core_type<tc>, window_params = [{pipeline_mode = #tpu.pipeline_mode<synchronous>, transform_indices = @transform_0, window_bounds = array<i64: 16, 128>}, {transform_indices = @transform_1, window_bounds = array<i64: 32, 1>}, {transform_indices = @transform_2, window_bounds = array<i64: 1, 32>}, {transform_indices = @transform_3, window_bounds = array<i64: 32, 1>}, {transform_indices = @transform_4, window_bounds = array<i64: 1, 1, 128>}, {transform_indices = @transform_5, window_bounds = array<i64: 1, 1, 128>}, {transform_indices = @transform_6, window_bounds = array<i64: 1, 1, 1>}, {transform_indices = @transform_7, window_bounds = array<i64: 1, 128, 128>}, {transform_indices = @transform_8, window_bounds = array<i64: 1, 1, 128>}, {transform_indices = @transform_9, window_bounds = array<i64: 1, 128, 128>}, {transform_indices = @transform_10, window_bounds = array<i64: 1, 1, 128>}, {pipeline_mode = #tpu.pipeline_mode<synchronous>, transform_indices = @transform_11, window_bounds = array<i64: 16, 128>}]} {
    %c0_i32 = arith.constant 0 : i32
    %0 = arith.cmpi eq, %arg0, %c0_i32 : i32
    %c0_i32_0 = arith.constant 0 : i32
    %1 = arith.cmpi eq, %arg1, %c0_i32_0 : i32
    %2 = arith.andi %0, %1 : i1
    %3 = arith.extui %2 : i1 to i32
    %c0_i32_1 = arith.constant 0 : i32
    %4 = arith.cmpi ne, %3, %c0_i32_1 : i32
    scf.if %4 {
      %c0_27 = arith.constant 0 : index
      %c0_28 = arith.constant 0 : index
      %47 = vector.load %arg2[%c0_27, %c0_28] : memref<16x128xf32, #tpu.memory_space<vmem>>, vector<16x128xf32>
      %c0_29 = arith.constant 0 : index
      %c0_30 = arith.constant 0 : index
      %48 = vector.load %arg14[%c0_29, %c0_30] : memref<16x128xf32, #tpu.memory_space<vmem>>, vector<16x128xf32>
      tpu.vector_store %arg14[%c0_29, %c0_30], %47 {strides = array<i32>} : memref<16x128xf32, #tpu.memory_space<vmem>>, vector<16x128xf32>,
    } else {
    }
    %c0_i32_2 = arith.constant 0 : i32
    %5 = arith.cmpi eq, %arg1, %c0_i32_2 : i32
    %6 = arith.extui %5 : i1 to i32
    %c0_i32_3 = arith.constant 0 : i32
    %7 = arith.cmpi ne, %6, %c0_i32_3 : i32
    scf.if %7 {
      %c0_27 = arith.constant 0 : index
      %c0_28 = arith.constant 0 : index
      %c0_29 = arith.constant 0 : index
      %47 = vector.load %arg8[%c0_27, %c0_28, %c0_29] : memref<1x1x1xf32, #tpu.memory_space<vmem>>, vector<1x1x1xf32>
      %48 = vector.shape_cast %47 : vector<1x1x1xf32> to vector<1x1xf32>
      %cst_30 = arith.constant 1.000000e+00 : f32
      %49 = vector.broadcast %cst_30 : f32 to vector<1x1xf32>
      %50 = arith.addf %49, %48 : vector<1x1xf32>
      %c0_31 = arith.constant 0 : index
      %c0_32 = arith.constant 0 : index
      %51 = vector.load %arg14[%c0_31, %c0_32] : memref<16x128xf32, #tpu.memory_space<vmem>>, vector<16x128xf32>
      %52 = vector.broadcast %50 : vector<1x1xf32> to vector<16x128xf32>
      %53 = arith.mulf %52, %51 : vector<16x128xf32>
      %c0_33 = arith.constant 0 : index
      %c0_34 = arith.constant 0 : index
      %54 = vector.load %arg15[%c0_33, %c0_34] : memref<16x128xf32, #tpu.memory_space<vmem>>, vector<16x128xf32>
      tpu.vector_store %arg15[%c0_33, %c0_34], %53 {strides = array<i32>} : memref<16x128xf32, #tpu.memory_space<vmem>>, vector<16x128xf32>,
    } else {
    }
    %c0 = arith.constant 0 : index
    %c0_4 = arith.constant 0 : index
    %8 = vector.load %arg14[%c0, %c0_4] : memref<16x128xf32, #tpu.memory_space<vmem>>, vector<16x128xf32>
    %c0_5 = arith.constant 0 : index
    %c0_6 = arith.constant 0 : index
    %9 = vector.load %arg5[%c0_5, %c0_6] : memref<32x1xf32, #tpu.memory_space<vmem>>, vector<32x1xf32>
    %c0_7 = arith.constant 0 : index
    %c0_8 = arith.constant 0 : index
    %c0_9 = arith.constant 0 : index
    %10 = vector.load %arg6[%c0_7, %c0_8, %c0_9] : memref<1x1x128xf32, #tpu.memory_space<vmem>>, vector<1x1x128xf32>
    %11 = vector.shape_cast %10 : vector<1x1x128xf32> to vector<1x128xf32>
    %12 = vector.broadcast %9 : vector<32x1xf32> to vector<32x128xf32>
    %13 = vector.broadcast %11 : vector<1x128xf32> to vector<32x128xf32>
    %14 = arith.mulf %12, %13 : vector<32x128xf32>
    %c0_10 = arith.constant 0 : index
    %c0_11 = arith.constant 0 : index
    %c0_12 = arith.constant 0 : index
    %15 = vector.load %arg7[%c0_10, %c0_11, %c0_12] : memref<1x1x128xf32, #tpu.memory_space<vmem>>, vector<1x1x128xf32>
    %16 = vector.shape_cast %15 : vector<1x1x128xf32> to vector<1x128xf32>
    %17 = vector.broadcast %16 : vector<1x128xf32> to vector<32x128xf32>
    %18 = arith.addf %14, %17 : vector<32x128xf32>
    %c0_13 = arith.constant 0 : index
    %c0_14 = arith.constant 0 : index
    %19 = vector.load %arg3[%c0_13, %c0_14] : memref<32x1xi32, #tpu.memory_space<vmem>>, vector<32x1xi32>
    %20 = tpu.iota {dimensions = array<i32: 1>} : vector<32x16xi32>
    %21 = vector.broadcast %19 : vector<32x1xi32> to vector<32x16xi32>
    %22 = arith.cmpi eq, %20, %21 : vector<32x16xi32>
    %23 = arith.extui %22 : vector<32x16xi1> to vector<32x16xi32>
    %24 = arith.sitofp %23 : vector<32x16xi32> to vector<32x16xf32>
    %cst = arith.constant dense<0.000000e+00> : vector<32x128xf32>
    %25 = tpu.matmul %24, %8, %cst {dimension_numbers = #tpu.dot_dimension_numbers<[1], [0], [0], [1], [0, 0, 1, 1], [], []>} : vector<32x16xf32>, vector<16x128xf32>, vector<32x128xf32> -> vector<32x128xf32>
    %26 = arith.addf %25, %18 : vector<32x128xf32>
    %cst_15 = arith.constant 0.000000e+00 : f32
    %27 = vector.broadcast %cst_15 : f32 to vector<32x128xf32>
    %28 = arith.maximumf %26, %27 : vector<32x128xf32>
    %c0_16 = arith.constant 0 : index
    %c0_17 = arith.constant 0 : index
    %29 = vector.load %arg4[%c0_16, %c0_17] : memref<1x32xi32, #tpu.memory_space<vmem>>, vector<1x32xi32>
    %30 = tpu.iota {dimensions = array<i32: 0>} : vector<16x32xi32>
    %31 = vector.broadcast %29 : vector<1x32xi32> to vector<16x32xi32>
    %32 = arith.cmpi eq, %30, %31 : vector<16x32xi32>
    %33 = arith.extui %32 : vector<16x32xi1> to vector<16x32xi32>
    %34 = arith.sitofp %33 : vector<16x32xi32> to vector<16x32xf32>
    %c0_18 = arith.constant 0 : index
    %c0_19 = arith.constant 0 : index
    %35 = vector.load %arg15[%c0_18, %c0_19] : memref<16x128xf32, #tpu.memory_space<vmem>>, vector<16x128xf32>
    %cst_20 = arith.constant dense<0.000000e+00> : vector<16x128xf32>
    %36 = tpu.matmul %34, %28, %cst_20 {dimension_numbers = #tpu.dot_dimension_numbers<[1], [0], [0], [1], [0, 0, 1, 1], [], []>} : vector<16x32xf32>, vector<32x128xf32>, vector<16x128xf32> -> vector<16x128xf32>
    %37 = arith.addf %35, %36 : vector<16x128xf32>
    %c0_21 = arith.constant 0 : index
    %c0_22 = arith.constant 0 : index
    %38 = vector.load %arg15[%c0_21, %c0_22] : memref<16x128xf32, #tpu.memory_space<vmem>>, vector<16x128xf32>
    tpu.vector_store %arg15[%c0_21, %c0_22], %37 {strides = array<i32>} : memref<16x128xf32, #tpu.memory_space<vmem>>, vector<16x128xf32>,
    %c0_i32_23 = arith.constant 0 : i32
    %39 = arith.cmpi eq, %arg1, %c0_i32_23 : i32
    %40 = arith.extui %39 : i1 to i32
    %c0_i32_24 = arith.constant 0 : i32
    %41 = arith.cmpi ne, %40, %c0_i32_24 : i32
    scf.if %41 {
      %c0_27 = arith.constant 0 : index
      %c0_28 = arith.constant 0 : index
      %47 = vector.load %arg15[%c0_27, %c0_28] : memref<16x128xf32, #tpu.memory_space<vmem>>, vector<16x128xf32>
      %c0_29 = arith.constant 0 : index
      %c0_30 = arith.constant 0 : index
      %c0_31 = arith.constant 0 : index
      %48 = vector.load %arg9[%c0_29, %c0_30, %c0_31] : memref<1x128x128xf32, #tpu.memory_space<vmem>>, vector<1x128x128xf32>
      %49 = vector.shape_cast %48 : vector<1x128x128xf32> to vector<128x128xf32>
      %cst_32 = arith.constant dense<0.000000e+00> : vector<16x128xf32>
      %50 = tpu.matmul %47, %49, %cst_32 {dimension_numbers = #tpu.dot_dimension_numbers<[1], [0], [0], [1], [0, 0, 1, 1], [], []>} : vector<16x128xf32>, vector<128x128xf32>, vector<16x128xf32> -> vector<16x128xf32>
      %c0_33 = arith.constant 0 : index
      %c0_34 = arith.constant 0 : index
      %c0_35 = arith.constant 0 : index
      %51 = vector.load %arg10[%c0_33, %c0_34, %c0_35] : memref<1x1x128xf32, #tpu.memory_space<vmem>>, vector<1x1x128xf32>
      %52 = vector.shape_cast %51 : vector<1x1x128xf32> to vector<1x128xf32>
      %53 = vector.broadcast %52 : vector<1x128xf32> to vector<16x128xf32>
      %54 = arith.addf %50, %53 : vector<16x128xf32>
      %cst_36 = arith.constant 0.000000e+00 : f32
      %55 = vector.broadcast %cst_36 : f32 to vector<16x128xf32>
      %56 = arith.maximumf %54, %55 : vector<16x128xf32>
      %c0_37 = arith.constant 0 : index
      %c0_38 = arith.constant 0 : index
      %c0_39 = arith.constant 0 : index
      %57 = vector.load %arg11[%c0_37, %c0_38, %c0_39] : memref<1x128x128xf32, #tpu.memory_space<vmem>>, vector<1x128x128xf32>
      %58 = vector.shape_cast %57 : vector<1x128x128xf32> to vector<128x128xf32>
      %cst_40 = arith.constant dense<0.000000e+00> : vector<16x128xf32>
      %59 = tpu.matmul %56, %58, %cst_40 {dimension_numbers = #tpu.dot_dimension_numbers<[1], [0], [0], [1], [0, 0, 1, 1], [], []>} : vector<16x128xf32>, vector<128x128xf32>, vector<16x128xf32> -> vector<16x128xf32>
      %c0_41 = arith.constant 0 : index
      %c0_42 = arith.constant 0 : index
      %c0_43 = arith.constant 0 : index
      %60 = vector.load %arg12[%c0_41, %c0_42, %c0_43] : memref<1x1x128xf32, #tpu.memory_space<vmem>>, vector<1x1x128xf32>
      %61 = vector.shape_cast %60 : vector<1x1x128xf32> to vector<1x128xf32>
      %62 = vector.broadcast %61 : vector<1x128xf32> to vector<16x128xf32>
      %63 = arith.addf %59, %62 : vector<16x128xf32>
      %cst_44 = arith.constant 0.000000e+00 : f32
      %64 = vector.broadcast %cst_44 : f32 to vector<16x128xf32>
      %65 = arith.maximumf %63, %64 : vector<16x128xf32>
      %c0_45 = arith.constant 0 : index
      %c0_46 = arith.constant 0 : index
      %66 = vector.load %arg14[%c0_45, %c0_46] : memref<16x128xf32, #tpu.memory_space<vmem>>, vector<16x128xf32>
      tpu.vector_store %arg14[%c0_45, %c0_46], %65 {strides = array<i32>} : memref<16x128xf32, #tpu.memory_space<vmem>>, vector<16x128xf32>,
    } else {
    }
    %c0_i32_25 = arith.constant 0 : i32
    %42 = arith.cmpi eq, %arg1, %c0_i32_25 : i32
    %c1_i32 = arith.constant 1 : i32
    %43 = arith.cmpi eq, %arg0, %c1_i32 : i32
    %44 = arith.andi %42, %43 : i1
    %45 = arith.extui %44 : i1 to i32
    %c0_i32_26 = arith.constant 0 : i32
    %46 = arith.cmpi ne, %45, %c0_i32_26 : i32
    scf.if %46 {
      %c0_27 = arith.constant 0 : index
      %c0_28 = arith.constant 0 : index
      %47 = vector.load %arg14[%c0_27, %c0_28] : memref<16x128xf32, #tpu.memory_space<vmem>>, vector<16x128xf32>
      %c0_29 = arith.constant 0 : index
      %c0_30 = arith.constant 0 : index
      %48 = vector.load %arg13[%c0_29, %c0_30] : memref<16x128xf32, #tpu.memory_space<vmem>>, vector<16x128xf32>
      tpu.vector_store %arg13[%c0_29, %c0_30], %47 {strides = array<i32>} : memref<16x128xf32, #tpu.memory_space<vmem>>, vector<16x128xf32>,
    } else {
    }
    return
  }
  func.func @transform_0(%arg0: i32, %arg1: i32) -> (i32, i32) {
    %c0_i32 = arith.constant 0 : i32
    %c0_i32_0 = arith.constant 0 : i32
    %c0_i32_1 = arith.constant 0 : i32
    return %c0_i32, %c0_i32_0 : i32, i32
  }
  func.func @transform_1(%arg0: i32, %arg1: i32) -> (i32, i32) {
    %c0_i32 = arith.constant 0 : i32
    %c0_i32_0 = arith.constant 0 : i32
    return %arg1, %c0_i32 : i32, i32
  }
  func.func @transform_2(%arg0: i32, %arg1: i32) -> (i32, i32) {
    %c0_i32 = arith.constant 0 : i32
    %c0_i32_0 = arith.constant 0 : i32
    return %c0_i32, %arg1 : i32, i32
  }
  func.func @transform_3(%arg0: i32, %arg1: i32) -> (i32, i32) {
    %c0_i32 = arith.constant 0 : i32
    %c0_i32_0 = arith.constant 0 : i32
    return %arg1, %c0_i32 : i32, i32
  }
  func.func @transform_4(%arg0: i32, %arg1: i32) -> (i32, i32, i32) {
    %c0_i32 = arith.constant 0 : i32
    %c0_i32_0 = arith.constant 0 : i32
    %c0_i32_1 = arith.constant 0 : i32
    return %arg0, %c0_i32, %c0_i32_0 : i32, i32, i32
  }
  func.func @transform_5(%arg0: i32, %arg1: i32) -> (i32, i32, i32) {
    %c0_i32 = arith.constant 0 : i32
    %c0_i32_0 = arith.constant 0 : i32
    %c0_i32_1 = arith.constant 0 : i32
    return %arg0, %c0_i32, %c0_i32_0 : i32, i32, i32
  }
  func.func @transform_6(%arg0: i32, %arg1: i32) -> (i32, i32, i32) {
    %c0_i32 = arith.constant 0 : i32
    %c0_i32_0 = arith.constant 0 : i32
    %c0_i32_1 = arith.constant 0 : i32
    return %arg0, %c0_i32, %c0_i32_0 : i32, i32, i32
  }
  func.func @transform_7(%arg0: i32, %arg1: i32) -> (i32, i32, i32) {
    %c0_i32 = arith.constant 0 : i32
    %c0_i32_0 = arith.constant 0 : i32
    %c0_i32_1 = arith.constant 0 : i32
    return %arg0, %c0_i32, %c0_i32_0 : i32, i32, i32
  }
  func.func @transform_8(%arg0: i32, %arg1: i32) -> (i32, i32, i32) {
    %c0_i32 = arith.constant 0 : i32
    %c0_i32_0 = arith.constant 0 : i32
    %c0_i32_1 = arith.constant 0 : i32
    return %arg0, %c0_i32, %c0_i32_0 : i32, i32, i32
  }
  func.func @transform_9(%arg0: i32, %arg1: i32) -> (i32, i32, i32) {
    %c0_i32 = arith.constant 0 : i32
    %c0_i32_0 = arith.constant 0 : i32
    %c0_i32_1 = arith.constant 0 : i32
    return %arg0, %c0_i32, %c0_i32_0 : i32, i32, i32
  }
  func.func @transform_10(%arg0: i32, %arg1: i32) -> (i32, i32, i32) {
    %c0_i32 = arith.constant 0 : i32
    %c0_i32_0 = arith.constant 0 : i32
    %c0_i32_1 = arith.constant 0 : i32
    return %arg0, %c0_i32, %c0_i32_0 : i32, i32, i32
  }
  func.func @transform_11(%arg0: i32, %arg1: i32) -> (i32, i32) {
    %c0_i32 = arith.constant 0 : i32
    %c0_i32_0 = arith.constant 0 : i32
    %c0_i32_1 = arith.constant 0 : i32
    return %c0_i32, %c0_i32_0 : i32, i32
  }
}

</mosaic_0001>

<bundles_post_ra>
// kernel: tpu_custom_call.1
= control target key start
LH: loop header
LB: loop body
LE: loop exit
PB: predicated region body
PF: predicated region fallthrough
CT: control target
= control target key end

     0   :  { %s1636_s0 = inlined_call_operand.vmem [shape: f32[16,128], index: 0, kind: input, shape index: {}]   ;;  %s1637_s1 = inlined_call_operand.vmem [shape: s32[32,1], index: 1, kind: input, shape index: {}]   ;;  %s1638_s2 = inlined_call_operand.vmem [shape: s32[1,32], index: 2, kind: input, shape index: {}]   ;;  %s1639_s3 = inlined_call_operand.vmem [shape: f32[32,1], index: 3, kind: input, shape index: {}]   ;;  %s1640_s4 = inlined_call_operand.vmem [shape: f32[2,1,128], index: 4, kind: input, shape index: {}]   ;;  %s1641_s5 = inlined_call_operand.vmem [shape: f32[2,1,128], index: 5, kind: input, shape index: {}]   ;;  %s1642_s6 = inlined_call_operand.vmem [shape: f32[2,1,1], index: 6, kind: input, shape index: {}]   ;;  %s1643_s7 = inlined_call_operand.hbm [shape: f32[2,128,128], index: 7, kind: input, shape index: {}]   ;;  %s1644_s8 = inlined_call_operand.vmem [shape: f32[2,1,128], index: 8, kind: input, shape index: {}]   ;;  %s1645_s9 = inlined_call_operand.hbm [shape: f32[2,128,128], index: 9, kind: input, shape index: {}]   ;;  %s1646_s10 = inlined_call_operand.vmem [shape: f32[2,1,128], index: 10, kind: input, shape index: {}]   ;;  %s1647_s11 = inlined_call_operand.hbm [shape: f32[16,128], index: 11, kind: output, shape index: {}]  }
   0x1   :  { %1653 = sst [smem:[#allocation18_spill]] %s1638_s2 }
   0x2   :  { %1654 = sst [smem:[#allocation19_spill]] %s1643_s7 }
   0x3   :  { %1655 = sst [smem:[#allocation20_spill]] %s1647_s11 }
   0x4   :  { %16 = vsyncpa [#allocation5], 0 }
   0x5   :  { %18 = vsyncpa [#allocation5 + $0x1], 0 }
   0x6   :  { %19 = vsyncpa [#allocation8], 0 }
   0x7   :  { %21 = vsyncpa [#allocation8 + $0x1], 0 }
   0x8   :  { %22 = vsyncpa [#allocation6], 0  ;;  %s1388_s17 = smov 0   ;;  %s1390_s18 = smov 0  }
   0x9   :  { %s1392_s19 = smov 0   ;;  %s1394_s20 = smov 0  }
   0xa   :  { %s1396_s21 = smov 0   ;;  %s1398_s22 = smov 0  }
   0xb LB: > { %1656 = sst [smem:[#allocation13_spill]] %s1307_s19  ;;  %s1648_s23 = sadd.s32 4294967295, %s1319_s22   ;;  %s1319_s22 = sphi %s1398_s22, %s28_s22   ;;  %s1315_s21 = sphi %s1396_s21, %s1673_s21   ;;  %s1311_s20 = sphi %s1394_s20, %s1672_s20   ;;  %s1307_s19 = sphi %s1392_s19, %s1671_s19   ;;  %s1303_s18 = sphi %s1390_s18, %s1675_s18   ;;  %s1299_s17 = sphi %s1388_s17, %s1674_s17  }
   0xc   : > { %1657 = sst [smem:[#allocation14_spill]] %s1315_s21  ;;  %s40_s24 = sadd.s32 1, %s1315_s21 }
   0xd   : > { %1658 = sst [smem:[#allocation15_spill]] %s1319_s22  ;;  %p42_p0 = scmp.ge.s32.totalorder %s40_s24, 2 }
   0xe   : > { %s224_s25 = sadd.s32 1, %s1307_s19  ;;  %p231_p1 = scmp.ne.s32.totalorder %s1307_s19, %s1303_s18 }
   0xf   : > { %p232_p2 = scmp.eq.s32.totalorder %s1319_s22, 0  ;;  %s1677_s24 = smov (%p42_p0, %s40_s24), 0 }
  0x10   : > { %1659 = sst [smem:[#allocation16_spill]] %s1677_s24  ;;  %p237_p4 = scmp.ne.s32.totalorder %s1303_s18, %s1299_s17 }
  0x11   : > { %p1424_p3 = por %p232_p2, %p231_p1  ;;  %s221_s27 = ssub.s32 %s1315_s21, %s1677_s24 }
  0x12   : > { %p238_p5 = scmp.eq.s32.totalorder %s1648_s23, 0  ;;  %p222_p6 = scmp.eq.s32.totalorder %s221_s27, 0 }
  0x13   : > { %p1107_p8 = scmp.lt.s32.totalorder %s1319_s22, 2  ;;  %s1442_s30 = sand.u32 1, %s1307_s19  }
  0x14   : > { %p1433_p7 = por %p238_p5, %p237_p4  ;;  %s1088_s12 = sshll.u32 %s1315_s21, 7 }
  0x15   : > { %s1439_s29 = scalar_select %p222_p6, %s1307_s19, %s224_s25  }
  0x16   : > { %s1061_s13 = sshll.u32 %s1442_s30, 7  ;;  %s1663_s7 = sld [smem:[#allocation19_spill]] }
  0x17   : > { %1662 = sst [smem:[#allocation17_spill]] %s1439_s29  ;;  %s409_s23 = scalar_lea.vmem [#allocation4], %s1061_s13 }
  0x18   : > { %s417_s27 = sshll.u32 %s409_s23, 4  ;;  %p1451_p9 = pnand %p1107_p8, %p1424_p3  ;;  %s418_s27 = int_to_ptr.vmem [resolvable:$true] %s417_s27 }
  0x19   : > { %p1067_p10 = scmp.ge.s32.totalorder %s1319_s22, 1  ;;  %p459_p11 = scmp.lt.s32.totalorder %s1319_s22, 3 }
  0x1a   : > { %s406_s24 = scalar_lea.sflag [#allocation5], %s1442_s30  ;;  %s1321_s21 = smov 128  }
  0x1b   : > { %s1322_s29 = smov 8   ;;  %p460_p12 = pnand %p1067_p10, %p459_p11 }
  0x1c   : > { %s414_s16 = scalar_lea.hbm %s1663_s7, %s1088_s12  ;;  %s442_s15 = scalar_lea.hbm %s1645_s9, %s1088_s12 }
  0x1d   : > { %s415_s17 = sshll.u32 %s414_s16, 4  ;;  %s443_s16 = sshll.u32 %s442_s15, 4  ;;  %s416_s17 = int_to_ptr.hbm [resolvable:$true] %s415_s17  ;;  %s444_s16 = int_to_ptr.hbm [resolvable:$true] %s443_s16 }
  0x1e   : > { %1103 = dma.hbm_to_vmem [thread:$0]  (!%p1451_p9), %s416_s17, 2048, %s418_s27, %s406_s24, %s1321_s21, %s1321_s21, %s1322_s29  }
  0x1f   : > { %s437_s26 = scalar_lea.vmem [#allocation7], %s1061_s13  ;;  %s434_s19 = scalar_lea.sflag [#allocation8], %s1442_s30 }
  0x20   : > { %s445_s7 = sshll.u32 %s437_s26, 4  ;;  %463 = sbr.rel (%p460_p12) target bundleno = 757 (0x2f5), region = 64  ;;  %s446_s7 = int_to_ptr.vmem [resolvable:$true] %s445_s7 }
  0x21   : > { %1106 = dma.hbm_to_vmem [thread:$0]  (!%p1451_p9), %s444_s16, 2048, %s446_s7, %s434_s19, %s1321_s21, %s1321_s21, %s1322_s29  }
  0x22   : > { %s465_s11 = sand.u32 (!%p460_p12), 1, %s1303_s18  }
  0x23   : > { %s1068_s22 = sshll.u32 (!%p460_p12), %s465_s11, 7  ;;  %s466_s2 = scalar_lea.sflag (!%p460_p12), [#allocation5], %s465_s11 }
  0x24   : > { %s1467_s24 = scalar_lea.vmem (!%p460_p12), [#allocation4], %s1068_s22 }
  0x25   : > { %1286 = dma.done.wait (%p1433_p7), %s466_s2, 2048  }
  0x26   : > { %1288 = vsyncadd (%p1433_p7), %s466_s2, 4294965248  ;;  %s476_s12 = scalar_lea.sflag [#allocation8], %s465_s11  ;;  %s1473_s13 = scalar_lea.vmem [#allocation7], %s1068_s22 }
  0x27   : > { %1290 = dma.done.wait (%p1433_p7), %s476_s12, 2048  }
  0x28   : > { %1292 = vsyncadd (%p1433_p7), %s476_s12, 4294965248  ;;  %p562_p13 = scmp.lt.s32.totalorder %s1311_s20, 1  ;;  %p577_p0 = scmp.eq.s32.totalorder %s1311_s20, 0 }
  0x29   : > { %v583_v0 = vld [vmem:[%s1636_s0] sm:$0xff] (%p577_p0)  ;;  %v584_v1 = vld [vmem:[%s1636_s0 + $0x8] sm:$0xff] (%p577_p0) }
  0x2a   : > { %s1482_s7 = scalar_select %p562_p13, %s1311_s20, 1  ;;  %585 = vst [vmem:[#allocation2] sm:$0xff] (%p577_p0), %v583_v0 }
  0x2b   : > { %582 = sbr.rel (!%p577_p0) target bundleno = 48 (0x30), region = 76  ;;  %586 = vst [vmem:[#allocation2 + $0x8] sm:$0xff] (%p577_p0), %v584_v1 }
  0x2c   : > { %s564_s2 = scalar_lea.vmem %s1640_s4, %s1482_s7  ;;  %s567_s28 = scalar_lea.vmem %s1641_s5, %s1482_s7 }
  0x2d   : > { %s570_s17 = scalar_lea.vmem %s1642_s6, %s1482_s7  ;;  %s573_s14 = scalar_lea.vmem %s1644_s8, %s1482_s7 }
  0x2e   : > { %s576_s16 = scalar_lea.vmem %s1646_s10, %s1482_s7 }
  0x30 PF: > { %v648_v2 = vld [vmem:[%s1637_s1 + $0x10] sm:$0xff]  ;;  %v646_v3 = vld [vmem:[%s1637_s1] sm:$0xff]  ;;  %v1323_v4 = vmov 0   ;;  %v649_v6 = vld [vmem:[%s1637_s1 + $0x18] sm:$0xff]  ;;  %v650_v11 = vlaneseq  ;;  %vm676_vm0 = vcmask 130048   ;;  %v1324_v17 = vmov 0.0  }
  0x31   : > { %1166 = vset.pattern.permute.xlu1 %v1323_v4  ;;  %1165 = vset.pattern.permute.xlu0 %v1323_v4  ;;  %v647_v7 = vld [vmem:[%s1637_s1 + $0x8] sm:$0xff]  ;;  %v606_v8 = vld [vmem:[%s1639_s3] sm:$0xff]  ;;  %v609_v12 = vld [vmem:[%s1639_s3 + $0x18] sm:$0xff]  ;;  %s1665_s12 = sld [smem:[#allocation18_spill]]  ;;  %vm735_vm6 = vcmask 261120   ;;  %p866_p1 = scmp.eq.s32.totalorder %s1311_s20, 1 }
  0x32   : > { %659 = vperm.xlu1 %1166, %v648_v2   ;;  %653 = vperm.xlu0 %1165, %v646_v3   ;;  %v1516_v5 = vld [vmem:[#allocation2 + $0x8] sm:$0xff]  ;;  %v1531_v10 = vld [vmem:[#allocation2] sm:$0xff]  ;;  %v651_v13 = vand.u32 127, %v650_v11  ;;  %v608_v15 = vld [vmem:[%s1639_s3 + $0x10] sm:$0xff]  ;;  %v724_v54 = vshrl.u32 %v650_v11, 7 }
  0x33   : > { %703 = vmatpush.msra.mxu0 %v1516_v5  ;;  %1167 = vset.pattern.permute.xlu2 %v1323_v4  ;;  %v607_v9 = vld [vmem:[%s1639_s3 + $0x8] sm:$0xff]  ;;  %v590_v16 = vld [vmem:[%s570_s17] sm:$0x1]  ;;  %v787_v32 = vld [vmem:[%s1467_s24 + $0x68] sm:$0xff] }
  0x34   : > { %628 = vperm.xlu2 %1167, %v609_v12   ;;  %v591_v19 = vadd.f32 1.0, %v590_v16  ;;  %v789_v30 = vld [vmem:[%s1467_s24 + $0x78] sm:$0xff]  ;;  %v788_v31 = vld [vmem:[%s1467_s24 + $0x70] sm:$0xff]  ;;  %v786_v36 = vld [vmem:[%s1467_s24 + $0x60] sm:$0xff]  ;;  %v725_v4 = vadd.s32 8, %v724_v54 }
  0x35   : > { %704 = vmatpush.msra.mxu0 %v1531_v10  ;;  %794 = vmatpush.msra.mxu2 %v789_v30  ;;  %v1168_v33 = vld [vmem:[%s564_s2] ss:$0 sm:$0xff]  ;;  %v785_v39 = vld [vmem:[%s1467_s24 + $0x58] sm:$0xff]  ;;  %v783_v46 = vld [vmem:[%s1467_s24 + $0x48] sm:$0xff] }
  0x36   : > { %v595_v21 = vperm.slane %v591_v19, 0  ;;  %v1169_v41 = vld [vmem:[%s567_s28] ss:$0 sm:$0xff]  ;;  %v782_v50 = vld [vmem:[%s1467_s24 + $0x40] sm:$0xff]  ;;  %v781_v56 = vld [vmem:[%s1467_s24 + $0x38] sm:$0xff] }
  0x37   : > { %795 = vmatpush.msra.mxu2 %v788_v31  ;;  %v784_v43 = vld [vmem:[%s1467_s24 + $0x50] sm:$0xff]  ;;  %v779_v63 = vld [vmem:[%s1467_s24 + $0x28] sm:$0xff]  ;;  %v778_v1 = vld [vmem:[%s1467_s24 + $0x20] sm:$0xff] }
  0x38   : > { %v1170_v55 = vld [vmem:[%s1665_s12] ss:$0 sm:$0xff]  ;;  %v774_v11 = vld [vmem:[%s1467_s24] sm:$0xff]  ;;  %v834_v12 = vld [vmem:[%s1473_s13 + $0x78] sm:$0xff] }
  0x39   : > { %796 = vmatpush.msra.mxu2 %v787_v32  ;;  %v780_v60 = vld [vmem:[%s1467_s24 + $0x30] sm:$0xff]  ;;  %vm727_vm5 = vcmp.eq.s32.totalorder %v724_v54, %v1170_v55  ;;  %vm728_vm7 = vcmp.eq.s32.totalorder %v725_v4, %v1170_v55  ;;  %839 = vmatpush.msra.mxu3 %v834_v12  ;;  %v830_v16 = vld [vmem:[%s1473_s13 + $0x58] sm:$0xff]  ;;  %v827_v19 = vld [vmem:[%s1473_s13 + $0x40] sm:$0xff] }
  0x3a   : > { %662 = vperm.xlu1 %1166, %v649_v6   ;;  %656 = vperm.xlu0 %1165, %v647_v7   ;;  %v1079_v3 = vsel %vm727_vm5, 1.0, %v1324_v17  ;;  %v777_v6 = vld [vmem:[%s1467_s24 + $0x18] sm:$0xff]  ;;  %v776_v7 = vld [vmem:[%s1467_s24 + $0x10] sm:$0xff] }
  0x3b   : > { %797 = vmatpush.msra.mxu2 %v786_v36  ;;  %v821_v32 = vld [vmem:[%s1473_s13 + $0x10] sm:$0xff] }
  0x3c   : > { %623 = vperm.xlu2 %1167, %v608_v15   ;;  %v831_v15 = vld [vmem:[%s1473_s13 + $0x60] sm:$0xff] }
  0x3d   : > { %798 = vmatpush.msra.mxu2 %v785_v39 }
  0x3f   : > { %799 = vmatpush.msra.mxu2 %v784_v43 }
  0x41   : > { %800 = vmatpush.msra.mxu2 %v783_v46 }
  0x42   : > { %613 = vperm.xlu1 %1166, %v606_v8   ;;  %618 = vperm.xlu0 %1165, %v607_v9   ;;  %v1080_v8 = vsel %vm728_vm7, 1.0, %v1324_v17  ;;  %v775_v9 = vld [vmem:[%s1467_s24 + $0x8] sm:$0xff] }
  0x43   : > { %801 = vmatpush.msra.mxu2 %v782_v50 }
  0x44   : > { %597 = vperm.xlu2 %1167, %v595_v21   ;;  %v825_v21 = vld [vmem:[%s1473_s13 + $0x30] sm:$0xff] }
  0x45   : > { %802 = vmatpush.msra.mxu2 %v781_v56 }
  0x47   : > { %803 = vmatpush.msra.mxu2 %v780_v60 }
  0x49   : > { %804 = vmatpush.msra.mxu2 %v779_v63 }
  0x4b   : > { %805 = vmatpush.msra.mxu2 %v778_v1 }
  0x4d   : > { %806 = vmatpush.msra.mxu2 %v777_v6 }
  0x4f   : > { %807 = vmatpush.msra.mxu2 %v776_v7 }
  0x51   : > { %808 = vmatpush.msra.mxu2 %v775_v9 }
  0x53   : > { %809 = vmatpush.msra.mxu2 %v774_v11 }
  0x8e   : > { %v629_v28 = vpop.permute.xlu2 %628 }
  0x8f   : > { %v637_v40 = vmul.f32 %v1168_v33, %v629_v28  ;;  %v822_v28 = vld [vmem:[%s1473_s13 + $0x18] sm:$0xff] }
  0x91   : > { %v645_v48 = vadd.f32 %v1169_v41, %v637_v40  ;;  %v1172_v40 = vld [vmem:[%s576_s16] ss:$0 sm:$0xff] }
  0x96   : > { %v624_v34 = vpop.permute.xlu2 %623 }
  0x97   : > { %v636_v37 = vmul.f32 %v1168_v33, %v624_v34  ;;  %v1171_v34 = vld [vmem:[%s573_s14] ss:$0 sm:$0xff] }
  0x99   : > { %v644_v45 = vadd.f32 %v1169_v41, %v636_v37 }
  0xa4   : > { %v654_v14 = vpop.permute.xlu0 %653  ;;  %v660_v23 = vpop.permute.xlu1 %659 }
  0xa5   : > { %vm664_vm1 = vcmp.eq.s32.totalorder %v651_v13, %v654_v14  ;;  %vm666_vm3 = vcmp.eq.s32.totalorder %v651_v13, %v660_v23  ;;  %v832_v14 = vld [vmem:[%s1473_s13 + $0x68] sm:$0xff] }
  0xa6   : > { %v1071_v18 = vsel %vm664_vm1, 1.0, %v1324_v17  ;;  %v1073_v24 = vsel %vm666_vm3, 1.0, %v1324_v17  ;;  %v824_v23 = vld [vmem:[%s1473_s13 + $0x28] sm:$0xff] }
  0xa7   : > { %1075 = vmatmul.msk.f32.vlgmr.msra.gmra.mxu0 %vm676_vm0, %v1071_v18  ;;  %v828_v18 = vld [vmem:[%s1473_s13 + $0x48] sm:$0xff] }
  0xac   : > { %v657_v20 = vpop.permute.xlu0 %656  ;;  %v663_v25 = vpop.permute.xlu1 %662 }
  0xad   : > { %vm665_vm2 = vcmp.eq.s32.totalorder %v651_v13, %v657_v20  ;;  %vm667_vm4 = vcmp.eq.s32.totalorder %v651_v13, %v663_v25  ;;  %v833_v13 = vld [vmem:[%s1473_s13 + $0x70] sm:$0xff]  ;;  %v826_v20 = vld [vmem:[%s1473_s13 + $0x38] sm:$0xff]  ;;  %v823_v25 = vld [vmem:[%s1473_s13 + $0x20] sm:$0xff] }
  0xae   : > { %v1072_v22 = vsel %vm665_vm2, 1.0, %v1324_v17  ;;  %v1074_v26 = vsel %vm667_vm4, 1.0, %v1324_v17  ;;  %840 = vmatpush.msra.mxu3 %v833_v13  ;;  %v829_v17 = vld [vmem:[%s1473_s13 + $0x50] sm:$0xff] }
  0xaf   : > { %1076 = vmatmul.msk.f32.gmra.mxu0 %vm676_vm0, %v1072_v22  ;;  %v598_v22 = vpop.permute.xlu2 %597 }
  0xb0   : > { %841 = vmatpush.msra.mxu3 %v832_v14 }
  0xb2   : > { %842 = vmatpush.msra.mxu3 %v831_v15 }
  0xb4   : > { %v619_v38 = vpop.permute.xlu0 %618  ;;  %v614_v42 = vpop.permute.xlu1 %613  ;;  %843 = vmatpush.msra.mxu3 %v830_v16 }
  0xb5   : > { %v635_v44 = vmul.f32 %v1168_v33, %v619_v38  ;;  %v634_v47 = vmul.f32 %v1168_v33, %v614_v42  ;;  %v819_v33 = vld [vmem:[%s1473_s13] sm:$0xff] }
  0xb6   : > { %844 = vmatpush.msra.mxu3 %v829_v17 }
  0xb7   : > { %1077 = vmatmul.msk.f32.gmra.mxu0 %vm676_vm0, %v1073_v24  ;;  %v643_v51 = vadd.f32 %v1169_v41, %v635_v44  ;;  %v642_v57 = vadd.f32 %v1169_v41, %v634_v47  ;;  %v600_v24 = vmul.f32 %v1531_v10, %v598_v22  ;;  %v820_v10 = vld [vmem:[%s1473_s13 + $0x8] sm:$0xff] }
  0xb8   : > { %845 = vmatpush.msra.mxu3 %v828_v18 }
  0xba   : > { %846 = vmatpush.msra.mxu3 %v827_v19 }
  0xbc   : > { %847 = vmatpush.msra.mxu3 %v826_v20 }
  0xbe   : > { %848 = vmatpush.msra.mxu3 %v825_v21 }
  0xbf   : > { %1078 = vmatmul.msk.f32.gmra.mxu0 %vm676_vm0, %v1074_v26 }
  0xc0   : > { %849 = vmatpush.msra.mxu3 %v824_v23 }
  0xc2   : > { %850 = vmatpush.msra.mxu3 %v823_v25 }
  0xc4   : > { %851 = vmatpush.msra.mxu3 %v822_v28 }
  0xc6   : > { %852 = vmatpush.msra.mxu3 %v821_v32 }
  0xc8   : > { %853 = vmatpush.msra.mxu3 %v820_v10 }
  0xca   : > { %854 = vmatpush.msra.mxu3 %v819_v33 }
 0x124   : > { %v706_v27 = vpop.f32.mrf.mxu0 }
 0x125   : > { %v707_v61 = vadd.f32 %v706_v27, %v642_v57 }
 0x127   : > { %v718_v2 = vmax.f32 %v707_v61, 0.0 }
 0x12c   : > { %v709_v29 = vpop.f32.mrf.mxu0 }
 0x12d   : > { %v710_v58 = vadd.f32 %v709_v29, %v643_v51  ;;  %v601_v29 = vmul.f32 %v1516_v5, %v598_v22 }
 0x12f   : > { %v719_v0 = vmax.f32 %v710_v58, 0.0 }
 0x134   : > { %v712_v35 = vpop.f32.mrf.mxu0 }
 0x135   : > { %v713_v52 = vadd.f32 %v712_v35, %v644_v45 }
 0x137   : > { %v720_v62 = vmax.f32 %v713_v52, 0.0 }
 0x13c   : > { %v715_v49 = vpop.f32.mrf.mxu0 }
 0x13d   : > { %v716_v53 = vadd.f32 %v715_v49, %v645_v48 }
 0x13f   : > { %v721_v59 = vmax.f32 %v716_v53, 0.0 }
 0x141   : > { %754 = vmatpush.msra.mxu1 %v721_v59 }
 0x143   : > { %755 = vmatpush.msra.mxu1 %v720_v62 }
 0x145   : > { %756 = vmatpush.msra.mxu1 %v719_v0 }
 0x147   : > { %757 = vmatpush.msra.mxu1 %v718_v2 }
 0x148   : > { %1081 = vmatmul.msk.f32.vlgmr.msra.gmra.mxu1 %vm735_vm6, %v1079_v3 }
 0x150   : > { %1082 = vmatmul.msk.f32.gmra.mxu1 %vm735_vm6, %v1080_v8 }
 0x1c5   : > { %v759_v26 = vpop.f32.mrf.mxu1 }
 0x1c6   : > { %v765_v27 = vadd.f32 %v759_v26, %v600_v24 }
 0x1c8   : > { %810 = vmatmul.f32.vlgmr.msra.gmra.mxu2 %v765_v27 }
 0x1cd   : > { %v762_v30 = vpop.f32.mrf.mxu1 }
 0x1ce   : > { %v766_v31 = vadd.f32 %v762_v30, %v601_v29 }
 0x1d0   : > { %813 = vmatmul.f32.gmra.mxu2 %v766_v31 }
 0x24b   : > { %v811_v35 = vpop.f32.mrf.mxu2 }
 0x24c   : > { %v812_v36 = vadd.f32 %v1171_v34, %v811_v35 }
 0x24e   : > { %v817_v37 = vmax.f32 %v812_v36, 0.0 }
 0x250   : > { %855 = vmatmul.f32.vlgmr.msra.gmra.mxu3 %v817_v37 }
 0x253   : > { %v814_v5 = vpop.f32.mrf.mxu2 }
 0x254   : > { %v815_v38 = vadd.f32 %v1171_v34, %v814_v5 }
 0x256   : > { %v818_v39 = vmax.f32 %v815_v38, 0.0 }
 0x258   : > { %858 = vmatmul.f32.gmra.mxu3 %v818_v39 }
 0x2d3   : > { %v856_v41 = vpop.f32.mrf.mxu3 }
 0x2d4   : > { %v857_v42 = vadd.f32 %v1172_v40, %v856_v41 }
 0x2d6   : > { %v862_v43 = vmax.f32 %v857_v42, 0.0 }
 0x2d8   : > { %864 = vst [vmem:[#allocation2] sm:$0xff] %v862_v43 }
 0x2db   : > { %v859_v44 = vpop.f32.mrf.mxu3 }
 0x2dc   : > { %v860_v45 = vadd.f32 %v1172_v40, %v859_v44  ;;  %870 = sbr.rel (!%p866_p1) target bundleno = 745 (0x2e9), region = 88 }
 0x2de   : > { %v863_v46 = vmax.f32 %v860_v45, 0.0 }
 0x2df   : > { %v871_v47 = vld [vmem:[#allocation2] sm:$0xff] (%p866_p1) }
 0x2e0   : > { %865 = vst [vmem:[#allocation2 + $0x8] sm:$0xff] %v863_v46 }
 0x2e1   : > { %873 = vst [vmem:[#allocation9] sm:$0xff] %v871_v47 }
 0x2e7   : > { %v872_v48 = vld [vmem:[#allocation2 + $0x8] sm:$0xff] }
 0x2e8   : > { %874 = vst [vmem:[#allocation9 + $0x8] sm:$0xff] %v872_v48 }
 0x2e9 PF: > { %s1666_s20 = sld [smem:[#allocation15_spill]]  ;;  %s1325_s29 = smov [#allocation9]  }
 0x2ea   : > { %s1668_s16 = sld [smem:[#allocation20_spill]]  ;;  %s880_s30 = sshll.u32 %s1325_s29, 4  ;;  %s881_s30 = int_to_ptr.vmem [resolvable:$true] %s880_s30 }
 0x2eb   : > { %s1326_s27 = smov 128   ;;  %s1327_s25 = smov 8  }
 0x2ef   : > { %s1667_s13 = sadd.s32 4294967295, %s1666_s20  }
 0x2f0   : > { %p1108_p2 = scmp.eq.s32.totalorder %s1667_s13, 1  ;;  %s882_s22 = sshll.u32 %s1668_s16, 4  ;;  %s883_s22 = int_to_ptr.hbm [resolvable:$true] %s882_s22 }
 0x2f2   : > { %1097 = dma.vmem_to_hbm [thread:$0]  (%p1108_p2), %s881_s30, 256, %s883_s22, [#allocation6], %s1326_s27, %s1326_s27, %s1327_s25  }
 0x2f3   : > { %1294 = dma.done.wait (%p1108_p2), [#allocation6], 256  }
 0x2f4   : > { %1296 = vsyncadd (%p1108_p2), [#allocation6], 4294967040 }
 0x2f5 PF: > { %s1669_s17 = sld [smem:[#allocation15_spill]] }
 0x2f6   : > { %s1670_s23 = sld [smem:[#allocation13_spill]] }
 0x2f7   : > { %s1671_s19 = sld [smem:[#allocation17_spill]] }
 0x2f8   : > { %s1672_s20 = sld [smem:[#allocation14_spill]] }
 0x2f9   : > { %s1673_s21 = sld [smem:[#allocation16_spill]] }
 0x2fb   : > { %s28_s22 = sadd.s32 1, %s1669_s17   ;;  %s1674_s17 = smov %s1303_s18 }
 0x2fc   : > { %p25_p3 = scmp.ge.s32.totalorder %s28_s22, 4   ;;  %s1675_s18 = smov %s1670_s23 }
 0x2fe   :  { %27 = sbr.rel (!%p25_p3) target bundleno = 11 (0xb), region = 154 }
 0x303   :  { %899 = vsyncpa [#allocation5], 1 }
 0x304   :  { %901 = vsyncpa [#allocation5 + $0x1], 1 }
 0x305   :  { %902 = vsyncpa [#allocation8], 1 }
 0x306   :  { %904 = vsyncpa [#allocation8 + $0x1], 1 }
 0x307   :  { %905 = vsyncpa [#allocation6], 1 }
 0x308   :  { %907 = vsyncpa [#allocation6 + $0x1], 1 }

</bundles_post_ra>
